<compile_context>
chip_gen: v6e
topology: v6e:2x2x1
jax: 0.10.0
libtpu: 0.0.40
codegen_flags: <defaults>
</compile_context>

<pallas_src>
import jax
import jax.numpy as jnp
from jax.experimental import pallas as pl
from jax.experimental.pallas import tpu as pltpu


IN_FEATURES = 5
OUT_FEATURES = 1

_LANE = 128                      # samples packed per reshaped row
_ROW = IN_FEATURES * _LANE       # 640 contiguous f32 per reshaped row
_SMALL_THRESHOLD = 1024          # below this many samples, use the single-block VPU kernel
_MAX_TBR = 64                    # max reshaped rows per tile (= 8192 samples per grid step)
_TARGET_GRID = 8                 # aim for >= 8 grid steps (pipelining + v7x 2-TC balance)


# ----------------------------------------------------------------------------
# Small-batch path: one full block, VPU broadcast-multiply + lane reduce.
# ----------------------------------------------------------------------------
def _linear_small_kernel(x_ref, w_ref, o_ref):
    # x_ref: [B, K], w_ref: [1, K]  ->  o_ref: [B, 1]
    x = x_ref[...].astype(jnp.float32)
    w = w_ref[...].astype(jnp.float32)
    o_ref[...] = jnp.sum(x * w, axis=-1, keepdims=True).astype(o_ref.dtype)


def _linear_small(x2d: jax.Array, w: jax.Array) -> jax.Array:
    """x2d: [B, K] (B small), w: [K] -> [B, 1]."""
    B, K = x2d.shape
    return pl.pallas_call(
        _linear_small_kernel,
        out_shape=jax.ShapeDtypeStruct((B, OUT_FEATURES), x2d.dtype),
        grid_spec=pltpu.PrefetchScalarGridSpec(
            num_scalar_prefetch=0,
            grid=(1,),
            # Blocks equal the full (small) array dims, so the (8,128) rule does not bind.
            in_specs=[
                pl.BlockSpec((B, K), lambda i: (0, 0)),
                pl.BlockSpec((1, K), lambda i: (0, 0)),
            ],
            out_specs=pl.BlockSpec((B, OUT_FEATURES), lambda i: (0, 0)),
        ),
        compiler_params=pltpu.CompilerParams(dimension_semantics=("arbitrary",)),
    )(x2d, w.reshape(1, K))


# ----------------------------------------------------------------------------
# Main path: copy-free [B/128, 640] presentation, MXU dot against expanded weight.
# ----------------------------------------------------------------------------
def _linear_mxu_kernel(xr_ref, w_ref, o_ref):
    # xr_ref: [TBr, 640], w_ref: [640, 128]  ->  o_ref: [TBr, 128]
    o_ref[...] = jnp.dot(
        xr_ref[...].astype(jnp.float32),
        w_ref[...],
        preferred_element_type=jnp.float32,
    ).astype(o_ref.dtype)


def _linear_mxu(xr: jax.Array, w_exp: jax.Array) -> jax.Array:
    """xr: [Br, 640] (128 samples per row), w_exp: [640, 128] -> [Br, 128]."""
    br = xr.shape[0]
    # Aim for ~_TARGET_GRID grid steps, rounded to a multiple of 8 rows, capped at _MAX_TBR.
    tbr = -(-br // _TARGET_GRID)            # ceil
    tbr = ((tbr + 7) // 8) * 8              # multiple of 8 sublanes
    tbr = max(8, min(_MAX_TBR, tbr))
    grid = (pl.cdiv(br, tbr),)              # partial last block is masked by Pallas

    n_samples = br * _LANE
    return pl.pallas_call(
        _linear_mxu_kernel,
        out_shape=jax.ShapeDtypeStruct((br, _LANE), xr.dtype),
        grid_spec=pltpu.PrefetchScalarGridSpec(
            num_scalar_prefetch=0,
            grid=grid,
            in_specs=[
                pl.BlockSpec((tbr, _ROW), lambda i: (i, 0)),      # contiguous input slab
                pl.BlockSpec((_ROW, _LANE), lambda i: (0, 0)),    # resident expanded weight
            ],
            out_specs=pl.BlockSpec((tbr, _LANE), lambda i: (i, 0)),
        ),
        compiler_params=pltpu.CompilerParams(
            # Independent batch tiles: shards across v7x's two TensorCores; no-op on v5e/v6e.
            dimension_semantics=("parallel",),
        ),
        cost_estimate=pl.CostEstimate(
            flops=2 * n_samples * IN_FEATURES,
            transcendentals=0,
            bytes_accessed=n_samples * (IN_FEATURES + OUT_FEATURES) * 4 + _ROW * _LANE * 4,
        ),
    )(xr, w_exp)


def _expand_weight(w: jax.Array) -> jax.Array:
    """[K] -> [K*128, 128] with W[i*K+k, j] = w[k] * (i == j)."""
    return jnp.kron(jnp.eye(_LANE, dtype=jnp.float32), w.astype(jnp.float32).reshape(IN_FEATURES, 1))


def linear_forward(x2d: jax.Array, w: jax.Array, w_exp: jax.Array) -> jax.Array:
    """x2d: [B, in_features] -> [B, 1]."""
    b = x2d.shape[0]
    if b < _SMALL_THRESHOLD:
        return _linear_small(x2d, w)

    b_main = (b // _LANE) * _LANE
    if b_main == b:
        # Pure copy-free path: reshape is a bitcast (row-major contiguous).
        xr = x2d.reshape(b // _LANE, _ROW)
        return _linear_mxu(xr, w_exp).reshape(b, OUT_FEATURES)

    # B not a multiple of 128: main part via the MXU kernel, <=127-sample tail via the
    # small VPU kernel.
    xr = x2d[:b_main].reshape(b_main // _LANE, _ROW)
    y_main = _linear_mxu(xr, w_exp).reshape(b_main, OUT_FEATURES)
    y_tail = _linear_small(x2d[b_main:], w)
    return jnp.concatenate([y_main, y_tail], axis=0)


class Model:
    """JAX/Pallas equivalent of the PyTorch Model (nn.Linear(5, 1, bias=False), ones init)."""

    def __init__(self):
        # torch: fc.weight has shape (1, 5), all ones.
        self.w = jnp.ones((IN_FEATURES,), dtype=jnp.float32)
        # Precomputed expanded weight for the MXU path (constant, 320 KiB).
        self.w_exp = _expand_weight(self.w)

    def __call__(self, x: jax.Array) -> jax.Array:
        # Accept arbitrary leading dims like torch.nn.Linear; flatten to 2D for the kernels.
        lead = x.shape[:-1]
        x2d = x.reshape((-1, x.shape[-1]))
        y2d = linear_forward(x2d, self.w, self.w_exp)
        return y2d.reshape(lead + (OUT_FEATURES,))


if __name__ == "__main__":
    key = jax.random.PRNGKey(0)
    model = Model()

    # 1) Tiny batch -> single-block VPU kernel.
    x_small = jax.random.normal(key, (8, IN_FEATURES), dtype=jnp.float32)
    y_small = jax.block_until_ready(model(x_small))
    ref_small = jnp.sum(x_small, axis=-1, keepdims=True)  # ones weight => row sums
    assert y_small.shape == (8, 1), y_small.shape
    assert jnp.allclose(y_small, ref_small, atol=1e-5, rtol=1e-5)

    # 2) Arbitrary leading dims (still the small path).
    x_lead = jax.random.normal(jax.random.fold_in(key, 1), (2, 3, IN_FEATURES), dtype=jnp.float32)
    y_lead = jax.block_until_ready(model(x_lead))
    ref_lead = jnp.sum(x_lead, axis=-1, keepdims=True)
    assert y_lead.shape == (2, 3, 1), y_lead.shape
    assert jnp.allclose(y_lead, ref_lead, atol=1e-5, rtol=1e-5)

    # 3) 128-aligned medium batch -> pure copy-free MXU path (partial last grid block: 16 rows,
    #    tile 8 rows -> grid=(2,)).
    x_aligned = jax.random.normal(jax.random.fold_in(key, 2), (2048, IN_FEATURES), dtype=jnp.float32)
    y_aligned = jax.block_until_ready(model(x_aligned))
    ref_aligned = jnp.sum(x_aligned, axis=-1, keepdims=True)
    assert y_aligned.shape == (2048, 1), y_aligned.shape
    assert jnp.allclose(y_aligned, ref_aligned, atol=1e-4, rtol=1e-5)

    # 4) Non-128-multiple medium batch -> MXU main part + small-kernel tail (2000 = 15*128 + 80),
    #    exercises the partial-block masking and the tail concat.
    x_med = jax.random.normal(jax.random.fold_in(key, 3), (2000, IN_FEATURES), dtype=jnp.float32)
    y_med = jax.block_until_ready(model(x_med))
    ref_med = jnp.sum(x_med, axis=-1, keepdims=True)
    assert y_med.shape == (2000, 1), y_med.shape
    assert jnp.allclose(y_med, ref_med, atol=1e-4, rtol=1e-5)

    print("KERNEL_OK")
</pallas_src>

<mosaic_0001>
module attributes {stable_mosaic.version = 11 : i64} {
  func.func @_linear_small_kernel(%arg0: i32, %arg1: memref<8x5xf32, #tpu.memory_space<vmem>>, %arg2: memref<1x5xf32, #tpu.memory_space<vmem>>, %arg3: memref<8x1xf32, #tpu.memory_space<vmem>>) attributes {dimension_semantics = [#tpu.dimension_semantics<arbitrary>], iteration_bounds = array<i64: 1>, scalar_prefetch = 0 : i64, scratch_operands = 0 : i64, tpu.core_type = #tpu.core_type<tc>, window_params = [{pipeline_mode = #tpu.pipeline_mode<synchronous>, transform_indices = @transform_0, window_bounds = array<i64: 8, 5>}, {pipeline_mode = #tpu.pipeline_mode<synchronous>, transform_indices = @transform_1, window_bounds = array<i64: 1, 5>}, {pipeline_mode = #tpu.pipeline_mode<synchronous>, transform_indices = @transform_2, window_bounds = array<i64: 8, 1>}]} {
    %c0 = arith.constant 0 : index
    %c0_0 = arith.constant 0 : index
    %0 = vector.load %arg1[%c0, %c0_0] : memref<8x5xf32, #tpu.memory_space<vmem>>, vector<8x5xf32>
    %c0_1 = arith.constant 0 : index
    %c0_2 = arith.constant 0 : index
    %1 = vector.load %arg2[%c0_1, %c0_2] : memref<1x5xf32, #tpu.memory_space<vmem>>, vector<1x5xf32>
    %2 = vector.broadcast %1 : vector<1x5xf32> to vector<8x5xf32>
    %3 = arith.mulf %0, %2 : vector<8x5xf32>
    %cst = arith.constant dense<0.000000e+00> : vector<8xf32>
    %4 = vector.multi_reduction <add>, %3, %cst [1] : vector<8x5xf32> to vector<8xf32>
    %5 = vector.shape_cast %4 : vector<8xf32> to vector<8x1xf32>
    %c0_3 = arith.constant 0 : index
    %c0_4 = arith.constant 0 : index
    %6 = vector.load %arg3[%c0_3, %c0_4] : memref<8x1xf32, #tpu.memory_space<vmem>>, vector<8x1xf32>
    tpu.vector_store %arg3[%c0_3, %c0_4], %5 {strides = array<i32>} : memref<8x1xf32, #tpu.memory_space<vmem>>, vector<8x1xf32>,
    return
  }
  func.func @transform_0(%arg0: i32) -> (i32, i32) {
    %c0_i32 = arith.constant 0 : i32
    %c0_i32_0 = arith.constant 0 : i32
    %c0_i32_1 = arith.constant 0 : i32
    return %c0_i32, %c0_i32_0 : i32, i32
  }
  func.func @transform_1(%arg0: i32) -> (i32, i32) {
    %c0_i32 = arith.constant 0 : i32
    %c0_i32_0 = arith.constant 0 : i32
    %c0_i32_1 = arith.constant 0 : i32
    return %c0_i32, %c0_i32_0 : i32, i32
  }
  func.func @transform_2(%arg0: i32) -> (i32, i32) {
    %c0_i32 = arith.constant 0 : i32
    %c0_i32_0 = arith.constant 0 : i32
    %c0_i32_1 = arith.constant 0 : i32
    return %c0_i32, %c0_i32_0 : i32, i32
  }
}

</mosaic_0001>

<bundles_post_ra>
// kernel: tpu_custom_call.1
= control target key start
LH: loop header
LB: loop body
LE: loop exit
PB: predicated region body
PF: predicated region fallthrough
CT: control target
= control target key end

     0   :  { %7 = vsyncpa [#allocation3], 0  ;;  %s67_s9 = smov [#allocation2]   ;;  %s92_s0 = inlined_call_operand.hbm [shape: f32[8,5], index: 0, kind: input, shape index: {}]   ;;  %s93_s1 = inlined_call_operand.vmem [shape: f32[1,5], index: 1, kind: input, shape index: {}]   ;;  %s94_s2 = inlined_call_operand.vmem [shape: f32[8,1], index: 2, kind: output, shape index: {}]  }
   0x1   :  { %s14_s10 = sshll.u32 %s67_s9, 4  ;;  %s15_s10 = int_to_ptr.vmem [resolvable:$true] %s14_s10 }
   0x2   :  { %s53_s11 = scalar_lea.vmem %s15_s10, 128  ;;  %p58_p1 = scmp.lt.s32.totalorder %s15_s10, %s15_s10 }
   0x3   :  { %p54_p0 = scmp.ne.s32.totalorder %s15_s10, %s53_s11  ;;  %p59_p2 = scmp.lt.s32.totalorder %s53_s11, %s53_s11 }
   0x5   :  { %p60_p3 = por %p59_p2, %p58_p1 }
   0x7   :  { %p61_p4 = pnand %p60_p3, %p54_p0 }
   0x9   :  { %64 = shalt.err (!%p61_p4)
}
   0xa   :  { %17 = dma.hbm_to_vmem [thread:$0]  %s92_s0, 128, %s15_s10, [#allocation3]  }
   0xb   :  { %65 = dma.done.wait [#allocation3], 128  }
   0xc   :  { %66 = vsyncadd [#allocation3], 4294967168  ;;  %v23_v0 = vld [vmem:[#allocation2] sm:$0xff]  ;;  %vm32_vm0 = vcmask 39936   ;;  %vm36_vm1 = vcmask 7168  }
   0xd   :  { %v43_v1 = vld [vmem:[%s93_s1] ss:$0 sm:$0xff] }
   0xe   :  { %v31_v2 = vmul.f32 %v43_v1, %v23_v0 }
  0x10   :  { %v33_v3 = vsel %vm32_vm0, %v31_v2, 0.0 }
  0x11   :  { %34 = vadd.xlane.f32.xlu0 %v33_v3 }
  0x9a   :  { %v35_v4 = vpop.xlane.xlu0 %34 }
  0x9b   :  { %37 = vst.msk [vmem:[%s94_s2] sm:$0xff] %vm36_vm1, %v35_v4 }
  0x9c   :  { %42 = vsyncpa [#allocation3], 1 }

</bundles_post_ra>
